<compile_context>
chip_gen: v6e
topology: v6e:2x2x1
jax: 0.10.0
libtpu: 0.0.40
codegen_flags: <defaults>
</compile_context>

<pallas_src>
import functools

import jax
import jax.numpy as jnp
from jax.experimental import pallas as pl
from jax.experimental.pallas import tpu as pltpu


def _round_up(x, m):
    return ((x + m - 1) // m) * m


def _fused_mlp_kernel(*refs, n_layers):
    """Fused MLP forward: x -> [Linear -> tanh] * (n-1) -> Linear.

    refs = (x_ref, w0_ref, b0_ref, w1_ref, b1_ref, ..., o_ref)
    x:  (B, F0)          w_i: (F_i, F_{i+1})       b_i: (1, F_{i+1})
    o:  (B, F_out_padded)   -- last layer padded to a 128-lane-dense store.

    Intermediates are plain values (compiler keeps them in VMEM/vregs);
    only the final padded result is stored.
    """
    x_ref = refs[0]
    o_ref = refs[-1]
    h = x_ref[...]
    for i in range(n_layers):
        w = refs[1 + 2 * i][...]
        b = refs[2 + 2 * i][...]
        h = jnp.dot(h, w, preferred_element_type=jnp.float32) + b
        if i < n_layers - 1:
            h = jnp.tanh(h)          # activation used by this PolicyModel
    o_ref[...] = h.astype(o_ref.dtype)


def _make_fused_forward(n_layers, out_padded, out_dim):
    """Build a single jitted callable: (x, params) -> (B, out_dim) f32."""
    kernel = functools.partial(_fused_mlp_kernel, n_layers=n_layers)

    def fwd(x, params):
        B = x.shape[0]
        flat = [x]
        for (w, b) in params:
            flat.append(w)
            flat.append(b)
        vmem = pl.BlockSpec(memory_space=pltpu.MemorySpace.VMEM)
        y = pl.pallas_call(
            kernel,
            out_shape=jax.ShapeDtypeStruct((B, out_padded), jnp.float32),
            in_specs=[vmem] * len(flat),   # whole arrays, VMEM-resident
            out_specs=vmem,                # lane-dense 128-wide slab
        )(*flat)
        return y[:, :out_dim]              # strip the zero padding (in-jit)

    return jax.jit(fwd)


class PolicyModelPallas:
    """JAX/Pallas port of PolicyModel(neurons, activation=tanh, scale)."""

    def __init__(self, neurons, scale=1.0, key=jax.random.PRNGKey(0)):
        self.neurons = list(neurons)
        self.scale = scale
        self.out_dim = int(neurons[-1])
        # Pad the final output width to a multiple of 128 lanes so the single
        # store in the kernel is unmasked (lane-dense).  Extra weight columns
        # / bias entries are zero, so the padded lanes are exactly zero and
        # get sliced off in the wrapper.
        self.out_padded = _round_up(self.out_dim, 128)

        n_layers = len(neurons) - 1
        params = []
        for i in range(n_layers):
            fan_in, fan_out = int(neurons[i]), int(neurons[i + 1])
            key, kw, kb = jax.random.split(key, 3)
            # deterministic init mimicking nn.Linear's U(-1/sqrt(fan_in), +)
            bound = 1.0 / float(fan_in) ** 0.5
            w = jax.random.uniform(kw, (fan_in, fan_out), jnp.float32,
                                   -bound, bound)
            b = jax.random.uniform(kb, (1, fan_out), jnp.float32,
                                   -bound, bound)
            if i == n_layers - 1 and fan_out != self.out_padded:
                pad = self.out_padded - fan_out
                w = jnp.pad(w, ((0, 0), (0, pad)))
                b = jnp.pad(b, ((0, 0), (0, pad)))
            params.append((w, b))
        self.params = tuple(params)

        # One jitted closure containing the single fused pallas_call; XLA
        # keeps the (tiny) weights on-device across calls.
        self._fwd = _make_fused_forward(n_layers, self.out_padded, self.out_dim)

    def forward(self, inputs):
        x = inputs.astype(jnp.float32)
        mean = self._fwd(x, self.params)
        return mean, self.scale
        # TODO(synk): Normal/sample/log_prob from BaseContinuousModel are
        # distribution utilities, not kernel work; use jax.random / analytic
        # log-prob on the returned (mean, scale) if needed.


def _reference_forward(model, x):
    """Pure-JAX reference (same padded params) for correctness checking."""
    x = x.astype(jnp.float32)
    n = len(model.params)
    for i, (w, b) in enumerate(model.params):
        x = x @ w + b
        if i < n - 1:
            x = jnp.tanh(x)
    return x[:, : model.out_dim]


if __name__ == "__main__":
    key = jax.random.PRNGKey(0)
    k_in, k_model = jax.random.split(key)

    # small MLP: obs_dim=32 -> hidden=64 -> hidden=64 -> action_dim=8
    neurons = [32, 64, 64, 8]
    batch = 8
    x = jax.random.normal(k_in, (batch, neurons[0]), jnp.float32)

    model = PolicyModelPallas(neurons, scale=1.0, key=k_model)

    mean, scale = model.forward(x)
    mean = jax.block_until_ready(mean)

    ref = _reference_forward(model, x)
    assert mean.shape == (batch, neurons[-1])
    assert jnp.allclose(mean, ref, atol=1e-5, rtol=1e-5), "mismatch vs reference"
    assert scale == 1.0

    print("KERNEL_OK")
</pallas_src>

<mosaic_0001>
module attributes {stable_mosaic.version = 11 : i64} {
  func.func @_fused_mlp_kernel(%arg0: memref<8x32xf32, #tpu.memory_space<vmem>>, %arg1: memref<32x64xf32, #tpu.memory_space<vmem>>, %arg2: memref<1x64xf32, #tpu.memory_space<vmem>>, %arg3: memref<64x64xf32, #tpu.memory_space<vmem>>, %arg4: memref<1x64xf32, #tpu.memory_space<vmem>>, %arg5: memref<64x128xf32, #tpu.memory_space<vmem>>, %arg6: memref<1x128xf32, #tpu.memory_space<vmem>>, %arg7: memref<8x128xf32, #tpu.memory_space<vmem>>) attributes {dimension_semantics = [], scalar_prefetch = 0 : i64, scratch_operands = 0 : i64, tpu.core_type = #tpu.core_type<tc>} {
    %c0 = arith.constant 0 : index
    %c0_0 = arith.constant 0 : index
    %0 = vector.load %arg0[%c0, %c0_0] : memref<8x32xf32, #tpu.memory_space<vmem>>, vector<8x32xf32>
    %c0_1 = arith.constant 0 : index
    %c0_2 = arith.constant 0 : index
    %1 = vector.load %arg1[%c0_1, %c0_2] : memref<32x64xf32, #tpu.memory_space<vmem>>, vector<32x64xf32>
    %c0_3 = arith.constant 0 : index
    %c0_4 = arith.constant 0 : index
    %2 = vector.load %arg2[%c0_3, %c0_4] : memref<1x64xf32, #tpu.memory_space<vmem>>, vector<1x64xf32>
    %cst = arith.constant dense<0.000000e+00> : vector<8x64xf32>
    %3 = tpu.matmul %0, %1, %cst {dimension_numbers = #tpu.dot_dimension_numbers<[1], [0], [0], [1], [0, 0, 1, 1], [], []>} : vector<8x32xf32>, vector<32x64xf32>, vector<8x64xf32> -> vector<8x64xf32>
    %4 = vector.broadcast %2 : vector<1x64xf32> to vector<8x64xf32>
    %5 = arith.addf %3, %4 : vector<8x64xf32>
    %6 = math.tanh %5 : vector<8x64xf32>
    %c0_5 = arith.constant 0 : index
    %c0_6 = arith.constant 0 : index
    %7 = vector.load %arg3[%c0_5, %c0_6] : memref<64x64xf32, #tpu.memory_space<vmem>>, vector<64x64xf32>
    %c0_7 = arith.constant 0 : index
    %c0_8 = arith.constant 0 : index
    %8 = vector.load %arg4[%c0_7, %c0_8] : memref<1x64xf32, #tpu.memory_space<vmem>>, vector<1x64xf32>
    %cst_9 = arith.constant dense<0.000000e+00> : vector<8x64xf32>
    %9 = tpu.matmul %6, %7, %cst_9 {dimension_numbers = #tpu.dot_dimension_numbers<[1], [0], [0], [1], [0, 0, 1, 1], [], []>} : vector<8x64xf32>, vector<64x64xf32>, vector<8x64xf32> -> vector<8x64xf32>
    %10 = vector.broadcast %8 : vector<1x64xf32> to vector<8x64xf32>
    %11 = arith.addf %9, %10 : vector<8x64xf32>
    %12 = math.tanh %11 : vector<8x64xf32>
    %c0_10 = arith.constant 0 : index
    %c0_11 = arith.constant 0 : index
    %13 = vector.load %arg5[%c0_10, %c0_11] : memref<64x128xf32, #tpu.memory_space<vmem>>, vector<64x128xf32>
    %c0_12 = arith.constant 0 : index
    %c0_13 = arith.constant 0 : index
    %14 = vector.load %arg6[%c0_12, %c0_13] : memref<1x128xf32, #tpu.memory_space<vmem>>, vector<1x128xf32>
    %cst_14 = arith.constant dense<0.000000e+00> : vector<8x128xf32>
    %15 = tpu.matmul %12, %13, %cst_14 {dimension_numbers = #tpu.dot_dimension_numbers<[1], [0], [0], [1], [0, 0, 1, 1], [], []>} : vector<8x64xf32>, vector<64x128xf32>, vector<8x128xf32> -> vector<8x128xf32>
    %16 = vector.broadcast %14 : vector<1x128xf32> to vector<8x128xf32>
    %17 = arith.addf %15, %16 : vector<8x128xf32>
    %c0_15 = arith.constant 0 : index
    %c0_16 = arith.constant 0 : index
    %18 = vector.load %arg7[%c0_15, %c0_16] : memref<8x128xf32, #tpu.memory_space<vmem>>, vector<8x128xf32>
    tpu.vector_store %arg7[%c0_15, %c0_16], %17 {strides = array<i32>} : memref<8x128xf32, #tpu.memory_space<vmem>>, vector<8x128xf32>,
    return
  }
}

</mosaic_0001>

<bundles_post_ra>
// kernel: fwd.1
= control target key start
LH: loop header
LB: loop body
LE: loop exit
PB: predicated region body
PF: predicated region fallthrough
CT: control target
= control target key end

     0   :  { %12 = vsyncpa [#allocation3], 0  ;;  %s672_s0 = inlined_call_operand.hbm [shape: f32[8,32], index: 0, kind: input, shape index: {}]   ;;  %s673_s1 = inlined_call_operand.hbm [shape: f32[32,64], index: 1, kind: input, shape index: {}]   ;;  %s674_s2 = inlined_call_operand.vmem [shape: f32[1,64], index: 2, kind: input, shape index: {}]   ;;  %s675_s3 = inlined_call_operand.hbm [shape: f32[64,64], index: 3, kind: input, shape index: {}]   ;;  %s676_s4 = inlined_call_operand.vmem [shape: f32[1,64], index: 4, kind: input, shape index: {}]   ;;  %s677_s5 = inlined_call_operand.hbm [shape: f32[64,128], index: 5, kind: input, shape index: {}]   ;;  %s678_s6 = inlined_call_operand.vmem [shape: f32[1,128], index: 6, kind: input, shape index: {}]   ;;  %s679_s7 = inlined_call_operand.hbm [shape: f32[8,128], index: 7, kind: output, shape index: {}]  }
   0x1   :  { %13 = vsyncpa [#allocation6], 0 }
   0x2   :  { %14 = vsyncpa [#allocation9], 0 }
   0x3   :  { %15 = vsyncpa [#allocation4], 0  ;;  %s562_s24 = smov [#allocation5]  }
   0x4   :  { %s31_s25 = sshll.u32 %s562_s24, 4  ;;  %s32_s25 = int_to_ptr.vmem [resolvable:$true] %s31_s25 }
   0x5   :  { %s462_s26 = scalar_lea.vmem %s32_s25, 512  ;;  %p467_p1 = scmp.lt.s32.totalorder %s32_s25, %s32_s25 }
   0x6   :  { %p463_p0 = scmp.ne.s32.totalorder %s32_s25, %s462_s26  ;;  %p468_p2 = scmp.lt.s32.totalorder %s462_s26, %s462_s26 }
   0x8   :  { %p469_p3 = por %p468_p2, %p467_p1 }
   0xa   :  { %p470_p4 = pnand %p469_p3, %p463_p0 }
   0xc   :  { %473 = shalt.err (!%p470_p4)
}
   0xd   :  { %s563_s27 = smov 128   ;;  %s564_s28 = smov 8  }
   0xe   :  { %37 = dma.hbm_to_vmem [thread:$0]  %s673_s1, 512, %s32_s25, [#allocation6], %s563_s27, %s563_s27, %s564_s28  }
   0xf   :  { %s565_s8 = smov [#allocation2]   ;;  %s566_s10 = smov [#allocation7]  }
  0x10   :  { %s22_s9 = sshll.u32 %s565_s8, 4  ;;  %s45_s11 = sshll.u32 %s566_s10, 4  ;;  %s23_s9 = int_to_ptr.vmem [resolvable:$true] %s22_s9  ;;  %s46_s11 = int_to_ptr.vmem [resolvable:$true] %s45_s11 }
  0x11   :  { %s482_s12 = scalar_lea.vmem %s23_s9, 128  ;;  %p487_p6 = scmp.lt.s32.totalorder %s23_s9, %s23_s9 }
  0x12   :  { %p483_p5 = scmp.ne.s32.totalorder %s23_s9, %s482_s12  ;;  %p488_p7 = scmp.lt.s32.totalorder %s482_s12, %s482_s12 }
  0x14   :  { %p489_p8 = por %p488_p7, %p487_p6 }
  0x16   :  { %p490_p9 = pnand %p489_p8, %p483_p5 }
  0x18   :  { %493 = shalt.err (!%p490_p9)
}
  0x19   :  { %25 = dma.hbm_to_vmem [thread:$0]  %s672_s0, 128, %s23_s9, [#allocation3]  }
  0x1a   :  { %s502_s15 = scalar_lea.vmem %s46_s11, 1024  ;;  %p507_p11 = scmp.lt.s32.totalorder %s46_s11, %s46_s11 }
  0x1b   :  { %p503_p10 = scmp.ne.s32.totalorder %s46_s11, %s502_s15  ;;  %p508_p12 = scmp.lt.s32.totalorder %s502_s15, %s502_s15 }
  0x1d   :  { %p509_p13 = por %p508_p12, %p507_p11 }
  0x1f   :  { %p510_p0 = pnand %p509_p13, %p503_p10 }
  0x21   :  { %513 = shalt.err (!%p510_p0)
}
  0x22   :  { %51 = dma.hbm_to_vmem [thread:$0]  %s675_s3, 1024, %s46_s11, [#allocation6], %s563_s27, %s563_s27, %s564_s28  }
  0x23   :  { %s567_s17 = smov [#allocation8]  }
  0x24   :  { %s59_s18 = sshll.u32 %s567_s17, 4  ;;  %s60_s18 = int_to_ptr.vmem [resolvable:$true] %s59_s18 }
  0x25   :  { %s522_s19 = scalar_lea.vmem %s60_s18, 1024  ;;  %p527_p2 = scmp.lt.s32.totalorder %s60_s18, %s60_s18 }
  0x26   :  { %p523_p1 = scmp.ne.s32.totalorder %s60_s18, %s522_s19  ;;  %p528_p3 = scmp.lt.s32.totalorder %s522_s19, %s522_s19 }
  0x28   :  { %p529_p4 = por %p528_p3, %p527_p2 }
  0x2a   :  { %p530_p5 = pnand %p529_p4, %p523_p1 }
  0x2c   :  { %533 = shalt.err (!%p530_p5)
}
  0x2d   :  { %65 = dma.hbm_to_vmem [thread:$0]  %s677_s5, 1024, %s60_s18, [#allocation9], %s563_s27, %s563_s27, %s564_s28  }
  0x2e   :  { %554 = dma.done.wait [#allocation3], 128  }
  0x2f   :  { %555 = vsyncadd [#allocation3], 4294967168 }
  0x30   :  { %556 = dma.done.wait [#allocation6], 1536  }
  0x31   :  { %557 = vsyncadd [#allocation6], 4294965760 }
  0x32   :  { %558 = dma.done.wait [#allocation9], 1024  }
  0x33   :  { %559 = vsyncadd [#allocation9], 4294966272  ;;  %v568_v0 = vmov 0.0   ;;  %vm569_vm0 = vmmov 0   ;;  %v84_v1 = vld [vmem:[#allocation5 + $0x18] sm:$0xff]  ;;  %v83_v2 = vld [vmem:[#allocation5 + $0x10] sm:$0xff] }
  0x34   :  { %392 = vmatprep.subr.mxu0 %v568_v0  ;;  %400 = vmatprep.mubr.msk.f32.mxu0 %vm569_vm0, %v568_v0  ;;  %v82_v3 = vld [vmem:[#allocation5 + $0x8] sm:$0xff]  ;;  %v81_v4 = vld [vmem:[#allocation5] sm:$0xff]  ;;  %v80_v5 = vld [vmem:[#allocation2] sm:$0xff]  ;;  %vm92_vm1 = vcmask 261120   ;;  %vm182_vm2 = vcmask 523264   ;;  %s570_s24 = smov [#allocation10]  }
  0x35   :  { %403 = vmatprep.subr.mxu1 %v568_v0  ;;  %419 = vmatprep.mubr.msk.f32.mxu1 %vm569_vm0, %v568_v0  ;;  %v174_v6 = vld [vmem:[#allocation7 + $0x38] sm:$0xff]  ;;  %v173_v7 = vld [vmem:[#allocation7 + $0x30] sm:$0xff]  ;;  %v172_v8 = vld [vmem:[#allocation7 + $0x28] sm:$0xff]  ;;  %s352_s25 = sshll.u32 %s570_s24, 4  ;;  %s353_s25 = int_to_ptr.vmem [resolvable:$true] %s352_s25 }
  0x36   :  { %393 = vmatpush3.msra.mxu0 %v84_v1  ;;  %404 = vmatpush3.msra.mxu1 %v174_v6  ;;  %v171_v9 = vld [vmem:[#allocation7 + $0x20] sm:$0xff]  ;;  %v170_v10 = vld [vmem:[#allocation7 + $0x18] sm:$0xff]  ;;  %v169_v11 = vld [vmem:[#allocation7 + $0x10] sm:$0xff]  ;;  %s534_s26 = scalar_lea.vmem %s353_s25, 128  ;;  %p539_p7 = scmp.lt.s32.totalorder %s353_s25, %s353_s25 }
  0x37   :  { %394 = vmatprep.subr.mxu0 %v568_v0  ;;  %405 = vmatprep.subr.mxu1 %v568_v0  ;;  %v168_v12 = vld [vmem:[#allocation7 + $0x8] sm:$0xff]  ;;  %v167_v13 = vld [vmem:[#allocation7] sm:$0xff]  ;;  %v363_v14 = vld [vmem:[%s674_s2] ss:$0 sm:$0xff]  ;;  %p535_p6 = scmp.ne.s32.totalorder %s353_s25, %s534_s26  ;;  %p540_p8 = scmp.lt.s32.totalorder %s534_s26, %s534_s26 }
  0x38   :  { %395 = vmatpush3.msra.mxu0 %v83_v2  ;;  %406 = vmatpush3.msra.mxu1 %v173_v7  ;;  %v264_v19 = vld [vmem:[#allocation8 + $0x38] sm:$0xff]  ;;  %v263_v20 = vld [vmem:[#allocation8 + $0x30] sm:$0xff]  ;;  %v262_v21 = vld [vmem:[#allocation8 + $0x28] sm:$0xff] }
  0x39   :  { %396 = vmatprep.subr.mxu0 %v568_v0  ;;  %407 = vmatprep.subr.mxu1 %v568_v0  ;;  %v261_v22 = vld [vmem:[#allocation8 + $0x20] sm:$0xff]  ;;  %v260_v23 = vld [vmem:[#allocation8 + $0x18] sm:$0xff]  ;;  %v259_v24 = vld [vmem:[#allocation8 + $0x10] sm:$0xff]  ;;  %p541_p9 = por %p540_p8, %p539_p7 }
  0x3a   :  { %397 = vmatpush3.msra.mxu0 %v82_v3  ;;  %408 = vmatpush3.msra.mxu1 %v172_v8  ;;  %v258_v25 = vld [vmem:[#allocation8 + $0x8] sm:$0xff]  ;;  %v257_v26 = vld [vmem:[#allocation8] sm:$0xff]  ;;  %v365_v27 = vld [vmem:[%s676_s4] ss:$0 sm:$0xff] }
  0x3b   :  { %398 = vmatprep.subr.mxu0 %v568_v0  ;;  %409 = vmatprep.subr.mxu1 %v568_v0  ;;  %v367_v32 = vld [vmem:[%s678_s6] ss:$0 sm:$0xff]  ;;  %p542_p10 = pnand %p541_p9, %p535_p6 }
  0x3c   :  { %399 = vmatpush3.msra.mxu0 %v81_v4  ;;  %410 = vmatpush3.msra.mxu1 %v171_v9 }
  0x3d   :  { %401 = vmatmul.mubr.msk.f32.vlgmr.msra.gmra.mxu0 %vm92_vm1, %v80_v5  ;;  %422 = vmatprep.subr.mxu0 %v568_v0 }
  0x3e   :  { %438 = vmatprep.mubr.msk.f32.mxu0 %vm569_vm0, %v568_v0  ;;  %411 = vmatprep.subr.mxu1 %v568_v0 }
  0x3f   :  { %412 = vmatpush3.msra.mxu1 %v170_v10  ;;  %423 = vmatpush3.msra.mxu0 %v264_v19 }
  0x40   :  { %413 = vmatprep.subr.mxu1 %v568_v0  ;;  %424 = vmatprep.subr.mxu0 %v568_v0 }
  0x41   :  { %414 = vmatpush3.msra.mxu1 %v169_v11  ;;  %425 = vmatpush3.msra.mxu0 %v263_v20 }
  0x42   :  { %415 = vmatprep.subr.mxu1 %v568_v0  ;;  %426 = vmatprep.subr.mxu0 %v568_v0 }
  0x43   :  { %416 = vmatpush3.msra.mxu1 %v168_v12  ;;  %427 = vmatpush3.msra.mxu0 %v262_v21 }
  0x44   :  { %417 = vmatprep.subr.mxu1 %v568_v0  ;;  %428 = vmatprep.subr.mxu0 %v568_v0 }
  0x45   :  { %418 = vmatpush3.msra.mxu1 %v167_v13  ;;  %429 = vmatpush3.msra.mxu0 %v261_v22 }
  0x46   :  { %430 = vmatprep.subr.mxu0 %v568_v0 }
  0x47   :  { %431 = vmatpush3.msra.mxu0 %v260_v23 }
  0x48   :  { %432 = vmatprep.subr.mxu0 %v568_v0 }
  0x49   :  { %433 = vmatpush3.msra.mxu0 %v259_v24 }
  0x4a   :  { %434 = vmatprep.subr.mxu0 %v568_v0 }
  0x4b   :  { %435 = vmatpush3.msra.mxu0 %v258_v25 }
  0x4c   :  { %436 = vmatprep.subr.mxu0 %v568_v0 }
  0x4d   :  { %437 = vmatpush3.msra.mxu0 %v257_v26 }
  0xfd   :  { %v162_v15 = vpop.f32.mrf.mxu0 }
  0xfe   :  { %v163_v16 = vadd.f32 %v363_v14, %v162_v15 }
  0xff   :  { %v402_v17 = vpop.f32.mrf.mxu0 }
 0x100   :  { %450 = vtanh.f32 %v163_v16 }
 0x10d   :  { %v451_v18 = vpop.eup %450 }
 0x10e   :  { %420 = vmatmul.mubr.msk.f32.vlgmr.msra.gmra.mxu1 %vm182_vm2, %v451_v18 }
 0x1ce   :  { %v252_v28 = vpop.f32.mrf.mxu1 }
 0x1cf   :  { %v253_v29 = vadd.f32 %v365_v27, %v252_v28 }
 0x1d0   :  { %v421_v30 = vpop.f32.mrf.mxu1 }
 0x1d1   :  { %452 = vtanh.f32 %v253_v29 }
 0x1de   :  { %v453_v31 = vpop.eup %452 }
 0x1df   :  { %439 = vmatmul.mubr.msk.f32.vlgmr.msra.gmra.mxu0 %vm182_vm2, %v453_v31 }
 0x29f   :  { %v341_v33 = vpop.f32.mrf.mxu0 }
 0x2a0   :  { %v342_v34 = vadd.f32 %v367_v32, %v341_v33 }
 0x2a1   :  { %v440_v35 = vpop.f32.mrf.mxu0 }
 0x2a2   :  { %345 = vst [vmem:[#allocation10] sm:$0xff] %v342_v34 }
 0x2a3   :  { %545 = shalt.err (!%p542_p10)
}
 0x2a4   :  { %355 = dma.vmem_to_hbm [thread:$0]  %s353_s25, 128, %s679_s7, [#allocation4]  }
 0x2a5   :  { %560 = dma.done.wait [#allocation4], 128  }
 0x2a6   :  { %561 = vsyncadd [#allocation4], 4294967168 }
 0x2a7   :  { %359 = vsyncpa [#allocation3], 1 }
 0x2a8   :  { %360 = vsyncpa [#allocation6], 1 }
 0x2a9   :  { %361 = vsyncpa [#allocation9], 1 }
 0x2aa   :  { %362 = vsyncpa [#allocation4], 1 }

</bundles_post_ra>
